<compile_context>
chip_gen: v5e
topology: v5e:2x2
jax: 0.10.0
libtpu: 0.0.40
codegen_flags: <defaults>
</compile_context>

<pallas_src>
import math

import jax
import jax.numpy as jnp
from jax.experimental import pallas as pl
from jax.experimental.pallas import tpu as pltpu


def build_pe(d_model: int, max_len: int = 5000, dtype=jnp.float32) -> jnp.ndarray:
    """Reproduces the PyTorch __init__ buffer exactly. Shape: (1, max_len, d_model).

    Note: the frequency term intentionally uses -log(max_len * 2) / d_model,
    matching the PyTorch module (NOT the standard -log(10000) / d_model).
    Build in the model's compute dtype (e.g. bf16) to halve pe DMA bytes.
    """
    position = jnp.arange(0, max_len, dtype=jnp.float32)[:, None]              # (max_len, 1)
    div_term = jnp.exp(
        jnp.arange(0, d_model, 2, dtype=jnp.float32)
        * (-math.log(max_len * 2) / d_model)
    )                                                                           # (d_model//2,)
    angles = position * div_term                                                # (max_len, d_model//2)
    pe = jnp.zeros((max_len, d_model), dtype=jnp.float32)
    pe = pe.at[:, 0::2].set(jnp.sin(angles))
    pe = pe.at[:, 1::2].set(jnp.cos(angles))
    return pe[None, :, :].astype(dtype)                                         # (1, max_len, d_model)


def _add_pe_kernel(x_ref, pe_ref, o_ref):
    # x_ref/o_ref: (B, T) lane-dense flat tile; pe_ref: (1, T) -- broadcast
    # across the batch (sublane) axis by the VPU, no extra HBM traffic.
    o_ref[...] = x_ref[...] + pe_ref[...]


def _pick_flat_tile(flat: int, batch: int, itemsize: int,
                    block_budget_bytes: int = 16 * 1024 * 1024) -> int:
    """Largest multiple-of-128 divisor of `flat` whose double-buffered blocks
    (x + out: `batch` rows each, pe: 1 row) fit in `block_budget_bytes`.
    The budget is conservative for v7x (64 MiB physical / 32 MiB scoped VMEM);
    on v5e/v6e it simply leaves more headroom."""
    if flat % 128 != 0:
        return flat                                   # full-extent fallback block
    per_elem = 2 * (2 * batch + 1) * itemsize         # 2 pipeline buffers
    max_tile = max(128, block_budget_bytes // per_elem)
    n128 = flat // 128
    best = 128
    for d in range(1, n128 + 1):
        if n128 % d == 0:
            t = 128 * d
            if best < t <= max_tile:
                best = t
    return best


def positional_encoding_forward(x: jnp.ndarray, pe: jnp.ndarray, step_pos=None) -> jnp.ndarray:
    """x: (B, S, D); pe: (1, max_len, D) from build_pe.

    Returns x + pe[:, :S, :], or x + pe[:, :step_pos, :] when step_pos is
    truthy (mirrors the PyTorch module's `if step_pos:` semantics, including
    step_pos=0/None falling through to the sequence-length path).
    """
    B, S, D = x.shape
    max_len = pe.shape[1]
    assert pe.shape == (1, max_len, D)

    length = int(step_pos) if step_pos else S         # PyTorch truthiness
    if length > max_len:
        raise ValueError(f"requested length {length} > max_len {max_len}")
    if length != S:
        if S == 1:
            # Decode-style broadcast: (B, 1, D) + (1, length, D).
            x = jnp.broadcast_to(x, (B, length, D))
            S = length
        else:
            # PyTorch would also fail to broadcast these shapes.
            raise ValueError(f"step_pos={length} incompatible with x.shape[1]={S}")

    flat = S * D
    itemsize = x.dtype.itemsize
    x_flat = x.reshape(B, flat)                              # free layout change
    pe_flat = pe.astype(x.dtype).reshape(1, max_len * D)     # keep pe in x.dtype

    tile = _pick_flat_tile(flat, B, itemsize)
    if flat % 128 == 0:
        pe_operand = pe_flat            # rows selected purely by the index_map
    else:
        # (8,128) rule fallback: last block dim must equal the array extent.
        pe_operand = pe_flat[:, :flat]
    n_tiles = flat // tile

    cost = pl.CostEstimate(
        flops=B * flat,
        transcendentals=0,
        bytes_accessed=(2 * B * flat + flat) * itemsize,     # x read + out write + pe read
    )

    out_flat = pl.pallas_call(
        _add_pe_kernel,
        out_shape=jax.ShapeDtypeStruct((B, flat), x.dtype),
        grid_spec=pltpu.PrefetchScalarGridSpec(
            num_scalar_prefetch=0,
            grid=(n_tiles,),
            in_specs=[
                pl.BlockSpec((B, tile), lambda t: (0, t)),   # x: all batch rows, one flat tile
                pl.BlockSpec((1, tile), lambda t: (0, t)),   # pe: one DMA per tile (shared by batch)
            ],
            out_specs=pl.BlockSpec((B, tile), lambda t: (0, t)),
        ),
        compiler_params=pltpu.CompilerParams(
            dimension_semantics=("parallel",),               # shard tiles across TCs on v7x
            vmem_limit_bytes=48 * 1024 * 1024,
        ),
        cost_estimate=cost,
        input_output_aliases={0: 0},                         # write result in place of x
    )(x_flat, pe_operand)

    return out_flat.reshape(B, S, D)


if __name__ == "__main__":
    # Small shapes consistent with the module: batch=2, seq=8, d_model=32.
    B, S, D = 2, 8, 32
    MAX_LEN = 64  # keep the table small for the example

    key = jax.random.PRNGKey(0)
    x = jax.random.normal(key, (B, S, D), dtype=jnp.float32)
    pe = build_pe(D, max_len=MAX_LEN, dtype=jnp.float32)

    # Default path (lane-dense: S*D = 256, tiled in multiples of 128).
    out = jax.block_until_ready(positional_encoding_forward(x, pe))
    ref = x + pe[:, :S, :]
    assert out.shape == (B, S, D)
    assert jnp.allclose(out, ref, atol=1e-6), "mismatch vs reference (default path)"

    # step_pos path (decode-style broadcast: x is (B, 1, D), step_pos=4).
    x_step = jax.random.normal(jax.random.PRNGKey(1), (B, 1, D), dtype=jnp.float32)
    out_step = jax.block_until_ready(positional_encoding_forward(x_step, pe, step_pos=4))
    ref_step = x_step + pe[:, :4, :]
    assert jnp.allclose(out_step, ref_step, atol=1e-6), "mismatch vs reference (step_pos path)"

    # Fallback path (S*D not a multiple of 128): full-extent blocks, still correct.
    B2, S2, D2 = 3, 5, 24
    pe2 = build_pe(D2, max_len=16, dtype=jnp.float32)
    x2 = jax.random.normal(jax.random.PRNGKey(2), (B2, S2, D2), dtype=jnp.float32)
    out2 = jax.block_until_ready(positional_encoding_forward(x2, pe2))
    ref2 = x2 + pe2[:, :S2, :]
    assert jnp.allclose(out2, ref2, atol=1e-6), "mismatch vs reference (fallback path)"

    print("KERNEL_OK")
</pallas_src>

<mosaic_0001>
module attributes {stable_mosaic.version = 11 : i64} {
  func.func @_add_pe_kernel(%arg0: i32, %arg1: memref<2x256xf32, #tpu.memory_space<vmem>>, %arg2: memref<1x256xf32, #tpu.memory_space<vmem>>, %arg3: memref<2x256xf32, #tpu.memory_space<vmem>>) attributes {dimension_semantics = [#tpu.dimension_semantics<parallel>], iteration_bounds = array<i64: 1>, scalar_prefetch = 0 : i64, scratch_operands = 0 : i64, tpu.core_type = #tpu.core_type<tc>, window_params = [{transform_indices = @transform_0, window_bounds = array<i64: 2, 256>}, {transform_indices = @transform_1, window_bounds = array<i64: 1, 256>}, {transform_indices = @transform_2, window_bounds = array<i64: 2, 256>}]} {
    %c0 = arith.constant 0 : index
    %c0_0 = arith.constant 0 : index
    %0 = vector.load %arg1[%c0, %c0_0] : memref<2x256xf32, #tpu.memory_space<vmem>>, vector<2x256xf32>
    %c0_1 = arith.constant 0 : index
    %c0_2 = arith.constant 0 : index
    %1 = vector.load %arg2[%c0_1, %c0_2] : memref<1x256xf32, #tpu.memory_space<vmem>>, vector<1x256xf32>
    %2 = vector.broadcast %1 : vector<1x256xf32> to vector<2x256xf32>
    %3 = arith.addf %0, %2 : vector<2x256xf32>
    %c0_3 = arith.constant 0 : index
    %c0_4 = arith.constant 0 : index
    %4 = vector.load %arg3[%c0_3, %c0_4] : memref<2x256xf32, #tpu.memory_space<vmem>>, vector<2x256xf32>
    tpu.vector_store %arg3[%c0_3, %c0_4], %3 {strides = array<i32>} : memref<2x256xf32, #tpu.memory_space<vmem>>, vector<2x256xf32>,
    return
  }
  func.func @transform_0(%arg0: i32) -> (i32, i32) {
    %c0_i32 = arith.constant 0 : i32
    %c0_i32_0 = arith.constant 0 : i32
    return %c0_i32, %arg0 : i32, i32
  }
  func.func @transform_1(%arg0: i32) -> (i32, i32) {
    %c0_i32 = arith.constant 0 : i32
    %c0_i32_0 = arith.constant 0 : i32
    return %c0_i32, %arg0 : i32, i32
  }
  func.func @transform_2(%arg0: i32) -> (i32, i32) {
    %c0_i32 = arith.constant 0 : i32
    %c0_i32_0 = arith.constant 0 : i32
    return %c0_i32, %arg0 : i32, i32
  }
}

</mosaic_0001>

<bundles_post_ra>
// kernel: tpu_custom_call.1
= control target key start
LH: loop header
LB: loop body
LE: loop exit
PB: predicated region body
PF: predicated region fallthrough
CT: control target
= control target key end

     0   :  { %7 = vsyncpa [#allocation3], 0  ;;  %s177_s0 = inlined_call_operand.hbm [shape: f32[2,256], index: 0, kind: input, shape index: {}, may-alias: {0,2}]   ;;  %s178_s1 = inlined_call_operand.hbm [shape: f32[1,2048], index: 1, kind: input, shape index: {}]   ;;  %s179_s2 = inlined_call_operand.hbm [shape: f32[2,256], index: 2, kind: output, shape index: {}, may-alias: {0,2}]  }
   0x1   :  { %8 = vsyncpa [#allocation6], 0 }
   0x2   :  { %9 = vsyncpa [#allocation4], 0  ;;  %s15_s11 = sshll.u32 %s177_s0, 4  ;;  %s150_s12 = smov [#allocation2]   ;;  %s16_s11 = int_to_ptr.hbm [resolvable:$true] %s15_s11 }
   0x3   :  { %s17_s13 = sshll.u32 %s150_s12, 4  ;;  %s26_s16 = sshll.u32 %s178_s1, 4  ;;  %s18_s13 = int_to_ptr.vmem [resolvable:$true] %s17_s13  ;;  %s27_s16 = int_to_ptr.hbm [resolvable:$true] %s26_s16 }
   0x4   :  { %20 = dma.hbm_to_vmem [thread:$0]  %s16_s11, 64, %s18_s13, [#allocation3]  }
   0x5   :  { %s151_s17 = smov [#allocation5]  }
   0x6   :  { %s28_s18 = sshll.u32 %s151_s17, 4  ;;  %s29_s18 = int_to_ptr.vmem [resolvable:$true] %s28_s18 }
   0x7   :  { %31 = dma.hbm_to_vmem [thread:$0]  %s27_s16, 32, %s29_s18, [#allocation6]  }
   0x8   :  { %144 = dma.done.wait [#allocation3], 64  }
   0x9   :  { %145 = vsyncadd [#allocation3], 4294967232 }
   0xa   :  { %146 = dma.done.wait [#allocation6], 32  }
   0xb   :  { %147 = vsyncadd [#allocation6], 4294967264  ;;  %v41_v0 = vld [vmem:[#allocation5] sm:$0x3]  ;;  %vm46_vm0 = vcmask 1041408   ;;  %s152_s0 = smov [#allocation7]  }
   0xc   :  { %v43_v1 = vperm.slane %v41_v0, 0  ;;  %v44_v2 = vperm.slane %v41_v0, 1  ;;  %v40_v3 = vld [vmem:[#allocation2] sm:$0xf]  ;;  %s56_s19 = sshll.u32 %s152_s0, 4  ;;  %s58_s21 = sshll.u32 %s179_s2, 4  ;;  %s57_s19 = int_to_ptr.vmem [resolvable:$true] %s56_s19  ;;  %s59_s21 = int_to_ptr.hbm [resolvable:$true] %s58_s21 }
   0xe   :  { %v45_v4 = vrot.slane %v44_v2, 6 }
  0x10   :  { %v47_v5 = vsel %vm46_vm0, %v43_v1, %v45_v4 }
  0x11   :  { %v49_v6 = vadd.f32 %v47_v5, %v40_v3 }
  0x13   :  { %50 = vst [vmem:[#allocation7] sm:$0xf] %v49_v6 }
  0x14   :  { %61 = dma.vmem_to_hbm [thread:$0]  %s57_s19, 64, %s59_s21, [#allocation4]  }
  0x15   :  { %148 = dma.done.wait [#allocation4], 64  }
  0x16   :  { %149 = vsyncadd [#allocation4], 4294967232 }
  0x17   :  { %66 = vsyncpa [#allocation3], 1 }
  0x18   :  { %67 = vsyncpa [#allocation6], 1 }
  0x19   :  { %68 = vsyncpa [#allocation4], 1 }

</bundles_post_ra>
